<compile_context>
chip_gen: v6e
topology: v6e:2x2x1
jax: 0.10.0
libtpu: 0.0.40
codegen_flags: <defaults>
</compile_context>

<pallas_src>
import jax
import jax.numpy as jnp
from jax.experimental import pallas as pl
from jax.experimental.pallas import tpu as pltpu


def _round_up(n, m):
    return ((n + m - 1) // m) * m


def _mlp_kernel(x_ref, w1_ref, b1_ref, w2_ref, b2_ref, w3_ref, b3_ref, o_ref):
    # Three bf16 MXU matmuls with f32 accumulation; bias/sigmoid in f32 on VPU/EUP.
    x = x_ref[...].astype(jnp.bfloat16)

    h1 = jnp.dot(x, w1_ref[...], preferred_element_type=jnp.float32) + b1_ref[...]
    h1 = jax.nn.sigmoid(h1)

    h2 = jnp.dot(h1.astype(jnp.bfloat16), w2_ref[...],
                 preferred_element_type=jnp.float32) + b2_ref[...]
    h2 = jax.nn.sigmoid(h2)

    out = jnp.dot(h2.astype(jnp.bfloat16), w3_ref[...],
                  preferred_element_type=jnp.float32) + b3_ref[...]
    o_ref[...] = out.astype(o_ref.dtype)


def prepare_params(w1, b1, w2, b2, w3, b3):
    """One-time parameter prep (hoisted out of the forward pass).

    - Zero-pads H2 and D_out up to multiples of 128 so every matmul output is
      lane-dense (padded h2 lanes are sigmoid(0)=0.5 but hit zero rows of w3p, so
      results are exact).
    - Casts weights to bf16 (MXU-native operands, half the resident-weight DMA).
      Biases stay f32.
    Returns (params_tuple, D_out).
    """
    H2 = w2.shape[1]
    D_out = w3.shape[1]
    H2p = _round_up(H2, 128)
    Dp = _round_up(D_out, 128)

    w2p = jnp.pad(w2, ((0, 0), (0, H2p - H2)))
    b2p = jnp.pad(b2, ((0, 0), (0, H2p - H2)))
    w3p = jnp.pad(w3, ((0, H2p - H2), (0, Dp - D_out)))
    b3p = jnp.pad(b3, ((0, 0), (0, Dp - D_out)))

    params = (
        w1.astype(jnp.bfloat16), b1.astype(jnp.float32),
        w2p.astype(jnp.bfloat16), b2p.astype(jnp.float32),
        w3p.astype(jnp.bfloat16), b3p.astype(jnp.float32),
    )
    return params, D_out


def _choose_tb(B, block_b, min_grid_steps):
    """Batch tile: as large as block_b allows, but with >= min_grid_steps grid steps
    (when B is big enough) so v7x's two TensorCores both get work."""
    tb = min(block_b, _round_up(B, 8))
    if min_grid_steps > 1 and B > 8 * min_grid_steps:
        tb = min(tb, _round_up(pl.cdiv(B, min_grid_steps), 8))
    return max(tb, 8)


def mlp_forward(x, params, d_out, *, block_b=1024, min_grid_steps=2,
                slice_output=True, out_dtype=None):
    """x: (B, D_in) f32; params from prepare_params(). Returns (B, d_out) logits
    (or the lane-padded (B, Dp) slab if slice_output=False)."""
    w1, b1, w2, b2, w3, b3 = params
    B, D_in = x.shape
    H1 = w1.shape[1]
    H2p = w2.shape[1]
    Dp = w3.shape[1]

    out_dtype = x.dtype if out_dtype is None else out_dtype

    TB = _choose_tb(B, block_b, min_grid_steps)
    grid = (pl.cdiv(B, TB),)  # partial last block handled by Pallas; no x padding

    # Constant index_map -> weights/biases stay VMEM-resident across the whole grid.
    resident = lambda shape: pl.BlockSpec(shape, lambda i: (0, 0))

    out = pl.pallas_call(
        _mlp_kernel,
        out_shape=jax.ShapeDtypeStruct((B, Dp), out_dtype),
        grid_spec=pl.GridSpec(
            grid=grid,
            in_specs=[
                pl.BlockSpec((TB, D_in), lambda i: (i, 0)),   # x: tiled over rows
                resident((D_in, H1)), resident((1, H1)),      # layer 1 (bf16 W, f32 b)
                resident((H1, H2p)), resident((1, H2p)),      # layer 2
                resident((H2p, Dp)), resident((1, Dp)),       # layer 3
            ],
            out_specs=pl.BlockSpec((TB, Dp), lambda i: (i, 0)),
        ),
        compiler_params=pltpu.CompilerParams(
            # "parallel" batch axis -> megacore sharding on v7x.  With the default
            # TB<=1024 the working set is far under v5e's 16 MiB scoped VMEM and v7x's
            # 64 MiB physical VMEM; set vmem_limit_bytes here only if TB is pushed
            # past ~2048 or the layer widths are scaled up.
            dimension_semantics=("parallel",),
        ),
    )(x, w1, b1, w2, b2, w3, b3)

    if slice_output:
        out = out[:, :d_out]
    return out


def init_params(key, D_in, H1, H2, D_out, dtype=jnp.float32):
    """Deterministic init mimicking nn.Linear's U(-1/sqrt(fan_in), 1/sqrt(fan_in)).
    Weights are stored transposed: (in_features, out_features)."""
    ks = jax.random.split(key, 6)

    def lin(kw, kb, fan_in, fan_out):
        bound = 1.0 / jnp.sqrt(fan_in)
        w = jax.random.uniform(kw, (fan_in, fan_out), dtype, -bound, bound)
        b = jax.random.uniform(kb, (1, fan_out), dtype, -bound, bound)
        return w, b

    w1, b1 = lin(ks[0], ks[1], D_in, H1)
    w2, b2 = lin(ks[2], ks[3], H1, H2)
    w3, b3 = lin(ks[4], ks[5], H2, D_out)
    return w1, b1, w2, b2, w3, b3


if __name__ == "__main__":
    # Small shapes consistent with the MNIST MLP forward (flattened image -> logits).
    B, D_in, H1, H2, D_out = 8, 256, 128, 64, 10

    key = jax.random.PRNGKey(0)
    kx, kp = jax.random.split(key)
    x = jax.random.normal(kx, (B, D_in), jnp.float32)
    raw_params = init_params(kp, D_in, H1, H2, D_out)

    # One-time prep (padding + bf16 cast) outside the hot forward path.
    params, d_out = prepare_params(*raw_params)

    out = mlp_forward(x, params, d_out)
    jax.block_until_ready(out)

    # Pure-JAX f32 reference of the same forward pass; tolerance loosened because the
    # kernel uses bf16 MXU operands (f32 accumulation).
    w1, b1, w2, b2, w3, b3 = raw_params
    ref = jax.nn.sigmoid(x @ w1 + b1)
    ref = jax.nn.sigmoid(ref @ w2 + b2)
    ref = ref @ w3 + b3

    assert out.shape == (B, D_out)
    max_err = float(jnp.max(jnp.abs(out - ref)))
    assert jnp.allclose(out, ref, atol=2e-2, rtol=2e-2), f"max abs err = {max_err}"

    print("KERNEL_OK")
</pallas_src>

<mosaic_0001>
module attributes {stable_mosaic.version = 11 : i64} {
  func.func @_mlp_kernel(%arg0: i32, %arg1: memref<8x256xf32, #tpu.memory_space<vmem>>, %arg2: memref<256x128xbf16, #tpu.memory_space<vmem>>, %arg3: memref<1x128xf32, #tpu.memory_space<vmem>>, %arg4: memref<128x128xbf16, #tpu.memory_space<vmem>>, %arg5: memref<1x128xf32, #tpu.memory_space<vmem>>, %arg6: memref<128x128xbf16, #tpu.memory_space<vmem>>, %arg7: memref<1x128xf32, #tpu.memory_space<vmem>>, %arg8: memref<8x128xf32, #tpu.memory_space<vmem>>) attributes {dimension_semantics = [#tpu.dimension_semantics<parallel>], iteration_bounds = array<i64: 1>, scalar_prefetch = 0 : i64, scratch_operands = 0 : i64, tpu.core_type = #tpu.core_type<tc>, window_params = [{transform_indices = @transform_0, window_bounds = array<i64: 8, 256>}, {pipeline_mode = #tpu.pipeline_mode<synchronous>, transform_indices = @transform_1, window_bounds = array<i64: 256, 128>}, {pipeline_mode = #tpu.pipeline_mode<synchronous>, transform_indices = @transform_2, window_bounds = array<i64: 1, 128>}, {pipeline_mode = #tpu.pipeline_mode<synchronous>, transform_indices = @transform_3, window_bounds = array<i64: 128, 128>}, {pipeline_mode = #tpu.pipeline_mode<synchronous>, transform_indices = @transform_4, window_bounds = array<i64: 1, 128>}, {pipeline_mode = #tpu.pipeline_mode<synchronous>, transform_indices = @transform_5, window_bounds = array<i64: 128, 128>}, {pipeline_mode = #tpu.pipeline_mode<synchronous>, transform_indices = @transform_6, window_bounds = array<i64: 1, 128>}, {transform_indices = @transform_7, window_bounds = array<i64: 8, 128>}]} {
    %c0 = arith.constant 0 : index
    %c0_0 = arith.constant 0 : index
    %0 = vector.load %arg1[%c0, %c0_0] : memref<8x256xf32, #tpu.memory_space<vmem>>, vector<8x256xf32>
    %1 = arith.truncf %0 : vector<8x256xf32> to vector<8x256xbf16>
    %c0_1 = arith.constant 0 : index
    %c0_2 = arith.constant 0 : index
    %2 = vector.load %arg2[%c0_1, %c0_2] : memref<256x128xbf16, #tpu.memory_space<vmem>>, vector<256x128xbf16>
    %cst = arith.constant dense<0.000000e+00> : vector<8x128xf32>
    %3 = tpu.matmul %1, %2, %cst {dimension_numbers = #tpu.dot_dimension_numbers<[1], [0], [0], [1], [0, 0, 1, 1], [], []>} : vector<8x256xbf16>, vector<256x128xbf16>, vector<8x128xf32> -> vector<8x128xf32>
    %c0_3 = arith.constant 0 : index
    %c0_4 = arith.constant 0 : index
    %4 = vector.load %arg3[%c0_3, %c0_4] : memref<1x128xf32, #tpu.memory_space<vmem>>, vector<1x128xf32>
    %5 = vector.broadcast %4 : vector<1x128xf32> to vector<8x128xf32>
    %6 = arith.addf %3, %5 : vector<8x128xf32>
    %7 = arith.negf %6 : vector<8x128xf32>
    %8 = math.exp %7 : vector<8x128xf32>
    %cst_5 = arith.constant 1.000000e+00 : f32
    %9 = vector.broadcast %cst_5 : f32 to vector<8x128xf32>
    %10 = arith.addf %9, %8 : vector<8x128xf32>
    %11 = arith.divf %9, %10 : vector<8x128xf32>
    %12 = arith.truncf %11 : vector<8x128xf32> to vector<8x128xbf16>
    %c0_6 = arith.constant 0 : index
    %c0_7 = arith.constant 0 : index
    %13 = vector.load %arg4[%c0_6, %c0_7] : memref<128x128xbf16, #tpu.memory_space<vmem>>, vector<128x128xbf16>
    %cst_8 = arith.constant dense<0.000000e+00> : vector<8x128xf32>
    %14 = tpu.matmul %12, %13, %cst_8 {dimension_numbers = #tpu.dot_dimension_numbers<[1], [0], [0], [1], [0, 0, 1, 1], [], []>} : vector<8x128xbf16>, vector<128x128xbf16>, vector<8x128xf32> -> vector<8x128xf32>
    %c0_9 = arith.constant 0 : index
    %c0_10 = arith.constant 0 : index
    %15 = vector.load %arg5[%c0_9, %c0_10] : memref<1x128xf32, #tpu.memory_space<vmem>>, vector<1x128xf32>
    %16 = vector.broadcast %15 : vector<1x128xf32> to vector<8x128xf32>
    %17 = arith.addf %14, %16 : vector<8x128xf32>
    %18 = arith.negf %17 : vector<8x128xf32>
    %19 = math.exp %18 : vector<8x128xf32>
    %cst_11 = arith.constant 1.000000e+00 : f32
    %20 = vector.broadcast %cst_11 : f32 to vector<8x128xf32>
    %21 = arith.addf %20, %19 : vector<8x128xf32>
    %22 = arith.divf %20, %21 : vector<8x128xf32>
    %23 = arith.truncf %22 : vector<8x128xf32> to vector<8x128xbf16>
    %c0_12 = arith.constant 0 : index
    %c0_13 = arith.constant 0 : index
    %24 = vector.load %arg6[%c0_12, %c0_13] : memref<128x128xbf16, #tpu.memory_space<vmem>>, vector<128x128xbf16>
    %cst_14 = arith.constant dense<0.000000e+00> : vector<8x128xf32>
    %25 = tpu.matmul %23, %24, %cst_14 {dimension_numbers = #tpu.dot_dimension_numbers<[1], [0], [0], [1], [0, 0, 1, 1], [], []>} : vector<8x128xbf16>, vector<128x128xbf16>, vector<8x128xf32> -> vector<8x128xf32>
    %c0_15 = arith.constant 0 : index
    %c0_16 = arith.constant 0 : index
    %26 = vector.load %arg7[%c0_15, %c0_16] : memref<1x128xf32, #tpu.memory_space<vmem>>, vector<1x128xf32>
    %27 = vector.broadcast %26 : vector<1x128xf32> to vector<8x128xf32>
    %28 = arith.addf %25, %27 : vector<8x128xf32>
    %c0_17 = arith.constant 0 : index
    %c0_18 = arith.constant 0 : index
    %29 = vector.load %arg8[%c0_17, %c0_18] : memref<8x128xf32, #tpu.memory_space<vmem>>, vector<8x128xf32>
    tpu.vector_store %arg8[%c0_17, %c0_18], %28 {strides = array<i32>} : memref<8x128xf32, #tpu.memory_space<vmem>>, vector<8x128xf32>,
    return
  }
  func.func @transform_0(%arg0: i32) -> (i32, i32) {
    %c0_i32 = arith.constant 0 : i32
    %c0_i32_0 = arith.constant 0 : i32
    return %arg0, %c0_i32 : i32, i32
  }
  func.func @transform_1(%arg0: i32) -> (i32, i32) {
    %c0_i32 = arith.constant 0 : i32
    %c0_i32_0 = arith.constant 0 : i32
    %c0_i32_1 = arith.constant 0 : i32
    return %c0_i32, %c0_i32_0 : i32, i32
  }
  func.func @transform_2(%arg0: i32) -> (i32, i32) {
    %c0_i32 = arith.constant 0 : i32
    %c0_i32_0 = arith.constant 0 : i32
    %c0_i32_1 = arith.constant 0 : i32
    return %c0_i32, %c0_i32_0 : i32, i32
  }
  func.func @transform_3(%arg0: i32) -> (i32, i32) {
    %c0_i32 = arith.constant 0 : i32
    %c0_i32_0 = arith.constant 0 : i32
    %c0_i32_1 = arith.constant 0 : i32
    return %c0_i32, %c0_i32_0 : i32, i32
  }
  func.func @transform_4(%arg0: i32) -> (i32, i32) {
    %c0_i32 = arith.constant 0 : i32
    %c0_i32_0 = arith.constant 0 : i32
    %c0_i32_1 = arith.constant 0 : i32
    return %c0_i32, %c0_i32_0 : i32, i32
  }
  func.func @transform_5(%arg0: i32) -> (i32, i32) {
    %c0_i32 = arith.constant 0 : i32
    %c0_i32_0 = arith.constant 0 : i32
    %c0_i32_1 = arith.constant 0 : i32
    return %c0_i32, %c0_i32_0 : i32, i32
  }
  func.func @transform_6(%arg0: i32) -> (i32, i32) {
    %c0_i32 = arith.constant 0 : i32
    %c0_i32_0 = arith.constant 0 : i32
    %c0_i32_1 = arith.constant 0 : i32
    return %c0_i32, %c0_i32_0 : i32, i32
  }
  func.func @transform_7(%arg0: i32) -> (i32, i32) {
    %c0_i32 = arith.constant 0 : i32
    %c0_i32_0 = arith.constant 0 : i32
    return %arg0, %c0_i32 : i32, i32
  }
}

</mosaic_0001>

<bundles_post_ra>
// kernel: tpu_custom_call.1
= control target key start
LH: loop header
LB: loop body
LE: loop exit
PB: predicated region body
PF: predicated region fallthrough
CT: control target
= control target key end

     0   :  { %12 = vsyncpa [#allocation3], 0  ;;  %s888_s0 = inlined_call_operand.hbm [shape: f32[8,256], index: 0, kind: input, shape index: {}]   ;;  %s889_s1 = inlined_call_operand.hbm [shape: bf16[256,128], index: 1, kind: input, shape index: {}]   ;;  %s890_s2 = inlined_call_operand.vmem [shape: f32[1,128], index: 2, kind: input, shape index: {}]   ;;  %s891_s3 = inlined_call_operand.hbm [shape: bf16[128,128], index: 3, kind: input, shape index: {}]   ;;  %s892_s4 = inlined_call_operand.vmem [shape: f32[1,128], index: 4, kind: input, shape index: {}]   ;;  %s893_s5 = inlined_call_operand.hbm [shape: bf16[128,128], index: 5, kind: input, shape index: {}]   ;;  %s894_s6 = inlined_call_operand.vmem [shape: f32[1,128], index: 6, kind: input, shape index: {}]   ;;  %s895_s7 = inlined_call_operand.hbm [shape: f32[8,128], index: 7, kind: output, shape index: {}]  }
   0x1   :  { %13 = vsyncpa [#allocation6], 0 }
   0x2   :  { %14 = vsyncpa [#allocation9], 0 }
   0x3   :  { %15 = vsyncpa [#allocation4], 0  ;;  %s788_s24 = smov [#allocation5]  }
   0x4   :  { %s31_s25 = sshll.u32 %s788_s24, 4  ;;  %s32_s25 = int_to_ptr.vmem [resolvable:$true] %s31_s25 }
   0x5   :  { %s688_s26 = scalar_lea.vmem %s32_s25, 2048  ;;  %p693_p1 = scmp.lt.s32.totalorder %s32_s25, %s32_s25 }
   0x6   :  { %p689_p0 = scmp.ne.s32.totalorder %s32_s25, %s688_s26  ;;  %p694_p2 = scmp.lt.s32.totalorder %s688_s26, %s688_s26 }
   0x8   :  { %p695_p3 = por %p694_p2, %p693_p1 }
   0xa   :  { %p696_p4 = pnand %p695_p3, %p689_p0 }
   0xc   :  { %699 = shalt.err (!%p696_p4)
}
   0xd   :  { %s789_s27 = smov 64   ;;  %s790_s28 = smov 4  }
   0xe   :  { %37 = dma.hbm_to_vmem [thread:$0]  %s889_s1, 2048, %s32_s25, [#allocation6], %s789_s27, %s789_s27, %s790_s28  }
   0xf   :  { %s791_s8 = smov [#allocation2]   ;;  %s792_s10 = smov [#allocation7]  }
  0x10   :  { %s22_s9 = sshll.u32 %s791_s8, 4  ;;  %s45_s11 = sshll.u32 %s792_s10, 4  ;;  %s23_s9 = int_to_ptr.vmem [resolvable:$true] %s22_s9  ;;  %s46_s11 = int_to_ptr.vmem [resolvable:$true] %s45_s11 }
  0x11   :  { %s708_s12 = scalar_lea.vmem %s23_s9, 256  ;;  %p713_p6 = scmp.lt.s32.totalorder %s23_s9, %s23_s9 }
  0x12   :  { %p709_p5 = scmp.ne.s32.totalorder %s23_s9, %s708_s12  ;;  %p714_p7 = scmp.lt.s32.totalorder %s708_s12, %s708_s12 }
  0x14   :  { %p715_p8 = por %p714_p7, %p713_p6 }
  0x16   :  { %p716_p9 = pnand %p715_p8, %p709_p5 }
  0x18   :  { %719 = shalt.err (!%p716_p9)
}
  0x19   :  { %25 = dma.hbm_to_vmem [thread:$0]  %s888_s0, 256, %s23_s9, [#allocation3]  }
  0x1a   :  { %s728_s15 = scalar_lea.vmem %s46_s11, 1024  ;;  %p733_p11 = scmp.lt.s32.totalorder %s46_s11, %s46_s11 }
  0x1b   :  { %p729_p10 = scmp.ne.s32.totalorder %s46_s11, %s728_s15  ;;  %p734_p12 = scmp.lt.s32.totalorder %s728_s15, %s728_s15 }
  0x1d   :  { %p735_p13 = por %p734_p12, %p733_p11 }
  0x1f   :  { %p736_p0 = pnand %p735_p13, %p729_p10 }
  0x21   :  { %739 = shalt.err (!%p736_p0)
}
  0x22   :  { %51 = dma.hbm_to_vmem [thread:$0]  %s891_s3, 1024, %s46_s11, [#allocation6], %s789_s27, %s789_s27, %s790_s28  }
  0x23   :  { %s793_s17 = smov [#allocation8]  }
  0x24   :  { %s59_s18 = sshll.u32 %s793_s17, 4  ;;  %s60_s18 = int_to_ptr.vmem [resolvable:$true] %s59_s18 }
  0x25   :  { %s748_s19 = scalar_lea.vmem %s60_s18, 1024  ;;  %p753_p2 = scmp.lt.s32.totalorder %s60_s18, %s60_s18 }
  0x26   :  { %p749_p1 = scmp.ne.s32.totalorder %s60_s18, %s748_s19  ;;  %p754_p3 = scmp.lt.s32.totalorder %s748_s19, %s748_s19 }
  0x28   :  { %p755_p4 = por %p754_p3, %p753_p2 }
  0x2a   :  { %p756_p5 = pnand %p755_p4, %p749_p1 }
  0x2c   :  { %759 = shalt.err (!%p756_p5)
}
  0x2d   :  { %65 = dma.hbm_to_vmem [thread:$0]  %s893_s5, 1024, %s60_s18, [#allocation9], %s789_s27, %s789_s27, %s790_s28  }
  0x2e   :  { %780 = dma.done.wait [#allocation3], 256  }
  0x2f   :  { %781 = vsyncadd [#allocation3], 4294967040 }
  0x30   :  { %782 = dma.done.wait [#allocation6], 3072  }
  0x31   :  { %783 = vsyncadd [#allocation6], 4294964224 }
  0x32   :  { %784 = dma.done.wait [#allocation9], 1024  }
  0x33   :  { %785 = vsyncadd [#allocation9], 4294966272  ;;  %v640_v0 = vld [vmem:[#allocation5 + $0x78] sm:$0xff]   ;;  %v642_v2 = vld [vmem:[#allocation5 + $0x70] sm:$0xff]   ;;  %v794_v21 = vmov 0.0   ;;  %vm795_vm0 = vmmov 0  }
  0x34   :  { %v641_v1 = vld [vmem:[#allocation5 + $0x38] sm:$0xff]   ;;  %551 = vmatprep.subr.bf16.mxu0 %v640_v0  ;;  %v643_v3 = vld [vmem:[#allocation5 + $0x30] sm:$0xff]   ;;  %v644_v4 = vld [vmem:[#allocation5 + $0x68] sm:$0xff]   ;;  %591 = vmatprep.subr.bf16.mxu1 %v794_v21  ;;  %s796_s24 = smov [#allocation10]  }
  0x35   :  { %552 = vmatpush3.bf16.msra.mxu0 %v641_v1  ;;  %v645_v5 = vld [vmem:[#allocation5 + $0x28] sm:$0xff]   ;;  %v646_v6 = vld [vmem:[#allocation5 + $0x60] sm:$0xff]   ;;  %v648_v8 = vld [vmem:[#allocation5 + $0x58] sm:$0xff]   ;;  %607 = vmatprep.mubr.msk.bf16.mxu1 %vm795_vm0, %v794_v21  ;;  %s503_s25 = sshll.u32 %s796_s24, 4  ;;  %s504_s25 = int_to_ptr.vmem [resolvable:$true] %s503_s25 }
  0x36   :  { %553 = vmatprep.subr.bf16.mxu0 %v642_v2  ;;  %v647_v7 = vld [vmem:[#allocation5 + $0x20] sm:$0xff]   ;;  %v649_v9 = vld [vmem:[#allocation5 + $0x18] sm:$0xff]   ;;  %v650_v10 = vld [vmem:[#allocation5 + $0x50] sm:$0xff]   ;;  %p765_p7 = scmp.lt.s32.totalorder %s504_s25, %s504_s25 }
  0x37   :  { %v82_v11 = vld [vmem:[#allocation2 + $0x8] sm:$0xff]  ;;  %v651_v12 = vld [vmem:[#allocation5 + $0x10] sm:$0xff]   ;;  %v652_v14 = vld [vmem:[#allocation5 + $0x48] sm:$0xff]  }
  0x38   :  { %v84_v13 = vpack.c.bf16 %v82_v11, %v82_v11  ;;  %v653_v15 = vld [vmem:[#allocation5 + $0x8] sm:$0xff]   ;;  %v654_v16 = vld [vmem:[#allocation5 + $0x40] sm:$0xff]   ;;  %v81_v18 = vld [vmem:[#allocation2] sm:$0xff] }
  0x39   :  { %554 = vmatpush3.bf16.msra.mxu0 %v643_v3  ;;  %v655_v17 = vld [vmem:[#allocation5] sm:$0xff]   ;;  %v83_v19 = vpack.c.bf16 %v81_v18, %v81_v18  ;;  %v656_v20 = vld [vmem:[#allocation7 + $0x38] sm:$0xff]   ;;  %v657_v22 = vld [vmem:[#allocation7 + $0x30] sm:$0xff]  }
  0x3a   :  { %555 = vmatprep.subr.bf16.mxu0 %v644_v4  ;;  %252 = vmatprep.mubr.bf16.mxu0 %v84_v13  ;;  %v658_v23 = vld [vmem:[#allocation7 + $0x28] sm:$0xff]   ;;  %v659_v24 = vld [vmem:[#allocation7 + $0x20] sm:$0xff]   ;;  %v660_v25 = vld [vmem:[#allocation7 + $0x18] sm:$0xff]  }
  0x3b   :  { %592 = vmatpush3.bf16.msra.mxu1 %v656_v20  ;;  %v661_v26 = vld [vmem:[#allocation7 + $0x10] sm:$0xff]   ;;  %v662_v27 = vld [vmem:[#allocation7 + $0x8] sm:$0xff]   ;;  %v663_v28 = vld [vmem:[#allocation7] sm:$0xff]  }
  0x3c   :  { %593 = vmatprep.subr.bf16.mxu1 %v794_v21  ;;  %v514_v30 = vld [vmem:[%s890_s2] ss:$0 sm:$0xff]  ;;  %v664_v41 = vld [vmem:[#allocation8 + $0x38] sm:$0xff]   ;;  %v666_v43 = vld [vmem:[#allocation8 + $0x28] sm:$0xff]  }
  0x3d   :  { %556 = vmatpush3.bf16.msra.mxu0 %v645_v5  ;;  %v665_v42 = vld [vmem:[#allocation8 + $0x30] sm:$0xff]   ;;  %v667_v44 = vld [vmem:[#allocation8 + $0x20] sm:$0xff]   ;;  %v668_v45 = vld [vmem:[#allocation8 + $0x18] sm:$0xff]  }
  0x3e   :  { %557 = vmatprep.subr.bf16.mxu0 %v646_v6  ;;  %v669_v46 = vld [vmem:[#allocation8 + $0x10] sm:$0xff]   ;;  %v670_v47 = vld [vmem:[#allocation8 + $0x8] sm:$0xff]   ;;  %v671_v48 = vld [vmem:[#allocation8] sm:$0xff]  }
  0x3f   :  { %594 = vmatpush3.bf16.msra.mxu1 %v657_v22  ;;  %v532_v49 = vld [vmem:[%s892_s4] ss:$0 sm:$0xff]  ;;  %s760_s4 = scalar_lea.vmem %s504_s25, 128 }
  0x40   :  { %595 = vmatprep.subr.bf16.mxu1 %v794_v21  ;;  %v542_v60 = vld [vmem:[%s894_s6] ss:$0 sm:$0xff]  ;;  %p761_p6 = scmp.ne.s32.totalorder %s504_s25, %s760_s4  ;;  %p766_p8 = scmp.lt.s32.totalorder %s760_s4, %s760_s4 }
  0x41   :  { %558 = vmatpush3.bf16.msra.mxu0 %v647_v7 }
  0x42   :  { %559 = vmatprep.subr.bf16.mxu0 %v648_v8  ;;  %p767_p9 = por %p766_p8, %p765_p7 }
  0x43   :  { %596 = vmatpush3.bf16.msra.mxu1 %v658_v23 }
  0x44   :  { %597 = vmatprep.subr.bf16.mxu1 %v794_v21  ;;  %p768_p10 = pnand %p767_p9, %p761_p6 }
  0x45   :  { %560 = vmatpush3.bf16.msra.mxu0 %v649_v9 }
  0x46   :  { %561 = vmatprep.subr.bf16.mxu0 %v650_v10 }
  0x47   :  { %598 = vmatpush3.bf16.msra.mxu1 %v659_v24 }
  0x48   :  { %599 = vmatprep.subr.bf16.mxu1 %v794_v21 }
  0x49   :  { %562 = vmatpush3.bf16.msra.mxu0 %v651_v12 }
  0x4a   :  { %563 = vmatprep.subr.bf16.mxu0 %v652_v14 }
  0x4b   :  { %600 = vmatpush3.bf16.msra.mxu1 %v660_v25 }
  0x4c   :  { %601 = vmatprep.subr.bf16.mxu1 %v794_v21 }
  0x4d   :  { %564 = vmatpush3.bf16.msra.mxu0 %v653_v15 }
  0x4e   :  { %565 = vmatprep.subr.bf16.mxu0 %v654_v16 }
  0x4f   :  { %602 = vmatpush3.bf16.msra.mxu1 %v661_v26 }
  0x50   :  { %603 = vmatprep.subr.bf16.mxu1 %v794_v21 }
  0x51   :  { %566 = vmatpush3.bf16.msra.mxu0 %v655_v17 }
  0x52   :  { %611 = vmatprep.subr.bf16.mxu0 %v794_v21 }
  0x53   :  { %604 = vmatpush3.bf16.msra.mxu1 %v662_v27 }
  0x54   :  { %253 = vmatmul.mubr.bf16.vlgmr.msra.gmra.mxu0 %v83_v19  ;;  %605 = vmatprep.subr.bf16.mxu1 %v794_v21 }
  0x55   :  { %627 = vmatprep.mubr.msk.bf16.mxu0 %vm795_vm0, %v794_v21  ;;  %612 = vmatpush3.bf16.msra.mxu0 %v664_v41 }
  0x56   :  { %613 = vmatprep.subr.bf16.mxu0 %v794_v21 }
  0x57   :  { %606 = vmatpush3.bf16.msra.mxu1 %v663_v28 }
  0x59   :  { %614 = vmatpush3.bf16.msra.mxu0 %v665_v42 }
  0x5a   :  { %615 = vmatprep.subr.bf16.mxu0 %v794_v21 }
  0x5d   :  { %616 = vmatpush3.bf16.msra.mxu0 %v666_v43 }
  0x5e   :  { %617 = vmatprep.subr.bf16.mxu0 %v794_v21 }
  0x61   :  { %618 = vmatpush3.bf16.msra.mxu0 %v667_v44 }
  0x62   :  { %619 = vmatprep.subr.bf16.mxu0 %v794_v21 }
  0x65   :  { %620 = vmatpush3.bf16.msra.mxu0 %v668_v45 }
  0x66   :  { %621 = vmatprep.subr.bf16.mxu0 %v794_v21 }
  0x69   :  { %622 = vmatpush3.bf16.msra.mxu0 %v669_v46 }
  0x6a   :  { %623 = vmatprep.subr.bf16.mxu0 %v794_v21 }
  0x6d   :  { %624 = vmatpush3.bf16.msra.mxu0 %v670_v47 }
  0x6e   :  { %625 = vmatprep.subr.bf16.mxu0 %v794_v21 }
  0x71   :  { %626 = vmatpush3.bf16.msra.mxu0 %v671_v48 }
 0x114   :  { %v567_v29 = vpop.f32.mrf.mxu0 }
 0x116   :  { %v568_v31 = vpop.f32.mrf.mxu0 }
 0x117   :  { %v569_v32 = vadd.f32 %v568_v31, %v567_v29 }
 0x118   :  { %v570_v33 = vpop.f32.mrf.mxu0 }
 0x119   :  { %v255_v34 = vadd.f32 %v569_v32, %v514_v30 }
 0x11a   :  { %v571_v35 = vpop.f32.mrf.mxu0 }
 0x11b   :  { %v531_v36 = vmul.f32 -1.442695, %v255_v34 }
 0x11d   :  { %672 = vpow2.f32 %v531_v36 }
 0x12a   :  { %v673_v37 = vpop.eup %672 }
 0x12b   :  { %v263_v38 = vadd.f32 1.0, %v673_v37 }
 0x12d   :  { %674 = vrcp.f32 %v263_v38 }
 0x13a   :  { %v675_v39 = vpop.eup %674 }
 0x13b   :  { %v266_v40 = vpack.c.bf16 %v675_v39, %v675_v39 }
 0x13d   :  { %608 = vmatmul.mubr.bf16.vlgmr.msra.gmra.mxu1 %v266_v40 }
 0x1fd   :  { %v372_v50 = vpop.f32.mrf.mxu1 }
 0x1fe   :  { %v373_v51 = vadd.f32 %v532_v49, %v372_v50 }
 0x1ff   :  { %v609_v52 = vpop.f32.mrf.mxu1 }
 0x200   :  { %v541_v53 = vmul.f32 -1.442695, %v373_v51 }
 0x201   :  { %v375_v54 = vpop.f32.mrf.mxu1 }
 0x202   :  { %676 = vpow2.f32 %v541_v53 }
 0x203   :  { %v610_v55 = vpop.f32.mrf.mxu1 }
 0x20f   :  { %v677_v56 = vpop.eup %676 }
 0x210   :  { %v381_v57 = vadd.f32 1.0, %v677_v56 }
 0x212   :  { %678 = vrcp.f32 %v381_v57 }
 0x21f   :  { %v679_v58 = vpop.eup %678 }
 0x220   :  { %v384_v59 = vpack.c.bf16 %v679_v58, %v679_v58 }
 0x222   :  { %628 = vmatmul.mubr.bf16.vlgmr.msra.gmra.mxu0 %v384_v59 }
 0x2e2   :  { %v490_v61 = vpop.f32.mrf.mxu0 }
 0x2e3   :  { %v491_v62 = vadd.f32 %v542_v60, %v490_v61 }
 0x2e4   :  { %v629_v63 = vpop.f32.mrf.mxu0 }
 0x2e5   :  { %496 = vst [vmem:[#allocation10] sm:$0xff] %v491_v62 }
 0x2e6   :  { %v493_v0 = vpop.f32.mrf.mxu0 }
 0x2e7   :  { %771 = shalt.err (!%p768_p10)
}
 0x2e8   :  { %506 = dma.vmem_to_hbm [thread:$0]  %s504_s25, 128, %s895_s7, [#allocation4]   ;;  %v630_v1 = vpop.f32.mrf.mxu0 }
 0x2e9   :  { %786 = dma.done.wait [#allocation4], 128  }
 0x2ea   :  { %787 = vsyncadd [#allocation4], 4294967168 }
 0x2eb   :  { %510 = vsyncpa [#allocation3], 1 }
 0x2ec   :  { %511 = vsyncpa [#allocation6], 1 }
 0x2ed   :  { %512 = vsyncpa [#allocation9], 1 }
 0x2ee   :  { %513 = vsyncpa [#allocation4], 1 }

</bundles_post_ra>
